<compile_context>
chip_gen: v5e
topology: v5e:2x2
jax: 0.10.0
libtpu: 0.0.40
codegen_flags: <defaults>
</compile_context>

<pallas_src>
import functools

import jax
import jax.numpy as jnp
from jax.experimental import pallas as pl
from jax.experimental.pallas import tpu as pltpu


# ------------------------------- kernels ------------------------------------


def _se_single_pass_kernel(x_ref, w1t_ref, b1_ref, w2t_ref, b2_ref, o_ref, *,
                           inv_hw, use_mxu_gap):
    """One block = (Bt, C, HW): GAP + MLP + rescale; x read once, written once."""
    xb = x_ref[...]                                               # (Bt, C, HW)

    if use_mxu_gap:
        # Sub-32-bit x: reduce along HW on the MXU (dot with ones, f32 accumulate)
        # so no (Bt, C, HW) f32 temporary is materialized.
        bt, c, hw = x_ref.shape
        ones = jnp.ones((hw, 1), dtype=xb.dtype)
        gap = jnp.dot(xb.reshape(bt * c, hw), ones,
                      preferred_element_type=jnp.float32).reshape(bt, c)
    else:
        # f32 x: astype is a no-op; plain lane reduction with f32 accumulation.
        gap = jnp.sum(xb.astype(jnp.float32), axis=2)
    gap = gap * inv_hw                                            # (Bt, C) f32

    # Tiny MLP: Linear -> ReLU -> Linear -> Sigmoid, all f32 (MXU + EUP).
    h = jnp.dot(gap, w1t_ref[...], preferred_element_type=jnp.float32) + b1_ref[...]
    h = jnp.maximum(h, 0.0)
    logits = jnp.dot(h, w2t_ref[...], preferred_element_type=jnp.float32) + b2_ref[...]
    attn = jax.nn.sigmoid(logits)                                 # (Bt, C) f32

    # Rescale in x's native dtype (no full-tile f32 temporary kept live). For f32
    # inputs this is exact; for bf16 it rounds the weight before the multiply,
    # a negligible difference vs. the reference.
    o_ref[...] = xb * attn.astype(o_ref.dtype)[:, :, None]


def _gap_mlp_kernel(x_ref, w1t_ref, b1_ref, w2t_ref, b2_ref, attn_ref, acc_ref, *,
                    inv_hw, hw_total, hw_tile):
    """Fallback pass 1: accumulate GAP over HW tiles; run the MLP on the last tile."""
    b = pl.program_id(0)
    t = pl.program_id(1)

    @pl.when(t == 0)
    def _():
        acc_ref[...] = jnp.zeros_like(acc_ref)

    xb = x_ref[...].astype(jnp.float32)                           # (1, C, hw_tile)
    # Mask lanes past the true HW on the (possibly ragged) last tile.
    lane = jax.lax.broadcasted_iota(jnp.int32, xb.shape, 2) + t * hw_tile
    xb = jnp.where(lane < hw_total, xb, 0.0)
    acc_ref[...] += jnp.sum(xb, axis=2)                           # (1, C)

    @pl.when(t == pl.num_programs(1) - 1)
    def _():
        gap = acc_ref[...] * inv_hw                               # (1, C)
        h = jnp.maximum(
            jnp.dot(gap, w1t_ref[...], preferred_element_type=jnp.float32)
            + b1_ref[...], 0.0)
        attn = jax.nn.sigmoid(
            jnp.dot(h, w2t_ref[...], preferred_element_type=jnp.float32)
            + b2_ref[...])
        attn_ref[pl.ds(b, 1), :] = attn                           # row b of (B, C)


def _rescale_kernel(attn_ref, x_ref, o_ref):
    """Fallback pass 2: out = x * attn, per (batch, HW-tile) block."""
    o_ref[...] = x_ref[...] * attn_ref[...].astype(o_ref.dtype)   # (1,C,hw) * (1,C,1)


# ------------------------------ wrappers -------------------------------------


def _chip_config():
    """Per-generation VMEM cap and whether the chip has two TensorCores."""
    kind = ""
    try:
        kind = jax.devices()[0].device_kind.lower()
    except Exception:
        pass
    if "v7" in kind:
        two_tc, cap = True, 48 * 1024 * 1024       # 64 MiB physical -> leave headroom
    elif "v5" in kind or "v6" in kind:
        two_tc, cap = False, 96 * 1024 * 1024      # 128 MiB physical
    else:
        two_tc, cap = False, 48 * 1024 * 1024      # unknown generation: v7x-safe cap
    try:  # refine from the hardware query when available
        phys = pltpu.get_tpu_info().vmem_capacity_bytes
        cap = min(cap, (int(phys) * 3) // 4)
    except Exception:
        pass
    return two_tc, cap


def _attention_two_pass(x3, w1t, b1_2d, w2t, b2_2d, *, inv_hw, vmem_cap, weight_bytes):
    """Slabs too big for one VMEM block: HW-tiled GAP+MLP, then HW-tiled rescale.

    Costs one extra read of x (3x vs. 2x HBM traffic) but bounds VMEM to a couple
    of HW tiles instead of a whole (C, HW) slab.
    """
    B, C, HW = x3.shape
    hidden = w1t.shape[1]
    dtype_bytes = jnp.dtype(x3.dtype).itemsize

    target = 2 * 1024 * 1024
    hw_tile = max(128, (target // max(C * dtype_bytes, 1)) // 128 * 128)
    hw_tile = min(hw_tile, HW)                     # equal-to-full also satisfies the rule
    n_hw = pl.cdiv(HW, hw_tile)

    tile_bytes = C * hw_tile * dtype_bytes
    # 2 in + 2 out buffers, f32 temporaries in the masked GAP path, weights, attn.
    needed = 4 * tile_bytes + 2 * C * hw_tile * 4 + weight_bytes + C * 4 * (B + 2)
    vmem_limit = int(min(vmem_cap, max(needed + needed // 2, 16 * 1024 * 1024)))

    gap_kernel = functools.partial(_gap_mlp_kernel, inv_hw=inv_hw,
                                   hw_total=HW, hw_tile=hw_tile)

    attn = pl.pallas_call(
        gap_kernel,
        out_shape=jax.ShapeDtypeStruct((B, C), jnp.float32),
        grid_spec=pltpu.PrefetchScalarGridSpec(
            num_scalar_prefetch=0,
            grid=(B, n_hw),
            in_specs=[
                pl.BlockSpec((1, C, hw_tile), lambda b, t: (b, 0, t)),
                pl.BlockSpec((C, hidden), lambda b, t: (0, 0)),
                pl.BlockSpec((1, hidden), lambda b, t: (0, 0)),
                pl.BlockSpec((hidden, C), lambda b, t: (0, 0)),
                pl.BlockSpec((1, C), lambda b, t: (0, 0)),
            ],
            out_specs=pl.BlockSpec((B, C), lambda b, t: (0, 0)),
            scratch_shapes=[pltpu.VMEM((1, C), jnp.float32)],
        ),
        compiler_params=pltpu.CompilerParams(
            dimension_semantics=("arbitrary", "arbitrary"),
            vmem_limit_bytes=vmem_limit,
        ),
    )(x3, w1t, b1_2d, w2t, b2_2d)

    attn3 = attn.reshape(B, C, 1)                  # tiny; broadcast axis for the rescale

    out3 = pl.pallas_call(
        _rescale_kernel,
        out_shape=jax.ShapeDtypeStruct((B, C, HW), x3.dtype),
        grid_spec=pltpu.PrefetchScalarGridSpec(
            num_scalar_prefetch=0,
            grid=(B, n_hw),
            in_specs=[
                pl.BlockSpec((1, C, 1), lambda b, t: (b, 0, 0)),
                pl.BlockSpec((1, C, hw_tile), lambda b, t: (b, 0, t)),
            ],
            out_specs=pl.BlockSpec((1, C, hw_tile), lambda b, t: (b, 0, t)),
        ),
        compiler_params=pltpu.CompilerParams(
            dimension_semantics=("parallel", "arbitrary"),
            vmem_limit_bytes=vmem_limit,
        ),
    )(attn3, x3)

    return out3


def attention_block(x, w1, b1, w2, b2):
    """x: (B, C, H, W); w1: (C//8, C); b1: (C//8,); w2: (C, C//8); b2: (C,)."""
    B, C, H, W = x.shape
    HW = H * W
    hidden = w1.shape[0]
    dtype_bytes = jnp.dtype(x.dtype).itemsize
    inv_hw = 1.0 / HW

    two_tc, vmem_cap = _chip_config()

    x3 = x.reshape(B, C, HW)                       # free, layout-preserving reshape
    w1t = jnp.transpose(w1)                        # (C, hidden)
    w2t = jnp.transpose(w2)                        # (hidden, C)
    b1_2d = b1.reshape(1, hidden)
    b2_2d = b2.reshape(1, C)

    weight_bytes = (2 * C * hidden + C + hidden) * 4
    headroom = 4 * 1024 * 1024
    # One block, double-buffered in + out => 4x block must fit under the cap.
    max_block_bytes = max((vmem_cap - weight_bytes - headroom) // 4, 512 * 1024)
    target_block_bytes = min(4 * 1024 * 1024, max_block_bytes)

    per_elem_bytes = C * HW * dtype_bytes          # one batch element's (C, HW) slab

    if per_elem_bytes > max_block_bytes:
        # Even a single batch element does not fit: bounded-VMEM two-pass path.
        out3 = _attention_two_pass(x3, w1t, b1_2d, w2t, b2_2d, inv_hw=inv_hw,
                                   vmem_cap=vmem_cap, weight_bytes=weight_bytes)
        return out3.reshape(B, C, H, W)

    # ---- single-pass path: whole (Bt, C, HW) slab resident per grid step -------
    Bt = max(1, min(B, target_block_bytes // per_elem_bytes))
    if two_tc and B >= 2:
        # v7x megacore: keep the "parallel" batch axis an even number of >= 2
        # steps so both TensorCores get balanced halves.
        n_steps = pl.cdiv(B, Bt)
        if n_steps == 1:
            Bt = pl.cdiv(B, 2)
        elif n_steps % 2 == 1:
            Bt = max(1, pl.cdiv(B, n_steps + 1))
    n_steps = pl.cdiv(B, Bt)

    block_bytes = Bt * per_elem_bytes
    needed = 4 * block_bytes + weight_bytes + 64 * 1024
    vmem_limit = int(min(vmem_cap, max(needed + needed // 2, 16 * 1024 * 1024)))

    use_mxu_gap = (dtype_bytes < 4) and (C % 8 == 0)
    kernel = functools.partial(_se_single_pass_kernel, inv_hw=inv_hw,
                               use_mxu_gap=use_mxu_gap)

    cost = pl.CostEstimate(
        flops=4 * B * C * hidden + 2 * B * C * HW,
        transcendentals=B * C,
        bytes_accessed=2 * B * C * HW * dtype_bytes + weight_bytes,
    )

    # TODO(synk): experiment with pipeline_mode=pl.Buffered(3) on the x input once
    # blocks are in the 1-8 MiB range (lets the next read start while the previous
    # write drains); revert on v7x if it pushes the VMEM total past the limit.
    out3 = pl.pallas_call(
        kernel,
        out_shape=jax.ShapeDtypeStruct((B, C, HW), x.dtype),
        grid_spec=pltpu.PrefetchScalarGridSpec(
            num_scalar_prefetch=0,
            grid=(n_steps,),
            in_specs=[
                pl.BlockSpec((Bt, C, HW), lambda b: (b, 0, 0)),
                pl.BlockSpec((C, hidden), lambda b: (0, 0)),
                pl.BlockSpec((1, hidden), lambda b: (0, 0)),
                pl.BlockSpec((hidden, C), lambda b: (0, 0)),
                pl.BlockSpec((1, C), lambda b: (0, 0)),
            ],
            out_specs=pl.BlockSpec((Bt, C, HW), lambda b: (b, 0, 0)),
        ),
        compiler_params=pltpu.CompilerParams(
            dimension_semantics=("parallel",),
            vmem_limit_bytes=vmem_limit,
        ),
        cost_estimate=cost,
    )(x3, w1t, b1_2d, w2t, b2_2d)

    return out3.reshape(B, C, H, W)


def _reference(x, w1, b1, w2, b2):
    # Pure-JAX reference matching the PyTorch forward pass.
    gap = jnp.mean(x, axis=(2, 3))                         # (B, C)
    h = jnp.maximum(gap @ w1.T + b1, 0.0)                  # (B, C//8)
    a = jax.nn.sigmoid(h @ w2.T + b2)                      # (B, C)
    return x * a[:, :, None, None]


if __name__ == "__main__":
    # in_channels must be >= 8 so that in_channels // 8 >= 1.
    B, C, H, W = 2, 32, 16, 16
    hidden = C // 8

    key = jax.random.PRNGKey(0)
    kx, k1, kb1, k2, kb2 = jax.random.split(key, 5)

    x = jax.random.normal(kx, (B, C, H, W), dtype=jnp.float32)
    # Deterministic synthetic parameters (shapes match nn.Linear weights).
    w1 = jax.random.normal(k1, (hidden, C), dtype=jnp.float32) * 0.1   # Linear(C, C//8).weight
    b1 = jax.random.normal(kb1, (hidden,), dtype=jnp.float32) * 0.1
    w2 = jax.random.normal(k2, (C, hidden), dtype=jnp.float32) * 0.1   # Linear(C//8, C).weight
    b2 = jax.random.normal(kb2, (C,), dtype=jnp.float32) * 0.1

    out = attention_block(x, w1, b1, w2, b2)
    out = jax.block_until_ready(out)

    ref = _reference(x, w1, b1, w2, b2)
    assert out.shape == (B, C, H, W)
    assert jnp.allclose(out, ref, atol=1e-5, rtol=1e-5), "mismatch vs reference"

    print("KERNEL_OK")
</pallas_src>

<mosaic_0001>
module attributes {stable_mosaic.version = 11 : i64} {
  func.func @_se_single_pass_kernel(%arg0: i32, %arg1: memref<2x32x256xf32, #tpu.memory_space<vmem>>, %arg2: memref<32x4xf32, #tpu.memory_space<vmem>>, %arg3: memref<1x4xf32, #tpu.memory_space<vmem>>, %arg4: memref<4x32xf32, #tpu.memory_space<vmem>>, %arg5: memref<1x32xf32, #tpu.memory_space<vmem>>, %arg6: memref<2x32x256xf32, #tpu.memory_space<vmem>>) attributes {dimension_semantics = [#tpu.dimension_semantics<parallel>], iteration_bounds = array<i64: 1>, scalar_prefetch = 0 : i64, scratch_operands = 0 : i64, tpu.core_type = #tpu.core_type<tc>, window_params = [{transform_indices = @transform_0, window_bounds = array<i64: 2, 32, 256>}, {pipeline_mode = #tpu.pipeline_mode<synchronous>, transform_indices = @transform_1, window_bounds = array<i64: 32, 4>}, {pipeline_mode = #tpu.pipeline_mode<synchronous>, transform_indices = @transform_2, window_bounds = array<i64: 1, 4>}, {pipeline_mode = #tpu.pipeline_mode<synchronous>, transform_indices = @transform_3, window_bounds = array<i64: 4, 32>}, {pipeline_mode = #tpu.pipeline_mode<synchronous>, transform_indices = @transform_4, window_bounds = array<i64: 1, 32>}, {transform_indices = @transform_5, window_bounds = array<i64: 2, 32, 256>}]} {
    %c0 = arith.constant 0 : index
    %c0_0 = arith.constant 0 : index
    %c0_1 = arith.constant 0 : index
    %0 = vector.load %arg1[%c0, %c0_0, %c0_1] : memref<2x32x256xf32, #tpu.memory_space<vmem>>, vector<2x32x256xf32>
    %cst = arith.constant dense<0.000000e+00> : vector<2x32xf32>
    %1 = vector.multi_reduction <add>, %0, %cst [2] : vector<2x32x256xf32> to vector<2x32xf32>
    %cst_2 = arith.constant 3.906250e-03 : f32
    %2 = vector.broadcast %cst_2 : f32 to vector<2x32xf32>
    %3 = arith.mulf %1, %2 : vector<2x32xf32>
    %c0_3 = arith.constant 0 : index
    %c0_4 = arith.constant 0 : index
    %4 = vector.load %arg2[%c0_3, %c0_4] : memref<32x4xf32, #tpu.memory_space<vmem>>, vector<32x4xf32>
    %cst_5 = arith.constant dense<0.000000e+00> : vector<2x4xf32>
    %5 = tpu.matmul %3, %4, %cst_5 {dimension_numbers = #tpu.dot_dimension_numbers<[1], [0], [0], [1], [0, 0, 1, 1], [], []>} : vector<2x32xf32>, vector<32x4xf32>, vector<2x4xf32> -> vector<2x4xf32>
    %c0_6 = arith.constant 0 : index
    %c0_7 = arith.constant 0 : index
    %6 = vector.load %arg3[%c0_6, %c0_7] : memref<1x4xf32, #tpu.memory_space<vmem>>, vector<1x4xf32>
    %7 = vector.broadcast %6 : vector<1x4xf32> to vector<2x4xf32>
    %8 = arith.addf %5, %7 : vector<2x4xf32>
    %cst_8 = arith.constant 0.000000e+00 : f32
    %9 = vector.broadcast %cst_8 : f32 to vector<2x4xf32>
    %10 = arith.maximumf %8, %9 : vector<2x4xf32>
    %c0_9 = arith.constant 0 : index
    %c0_10 = arith.constant 0 : index
    %11 = vector.load %arg4[%c0_9, %c0_10] : memref<4x32xf32, #tpu.memory_space<vmem>>, vector<4x32xf32>
    %cst_11 = arith.constant dense<0.000000e+00> : vector<2x32xf32>
    %12 = tpu.matmul %10, %11, %cst_11 {dimension_numbers = #tpu.dot_dimension_numbers<[1], [0], [0], [1], [0, 0, 1, 1], [], []>} : vector<2x4xf32>, vector<4x32xf32>, vector<2x32xf32> -> vector<2x32xf32>
    %c0_12 = arith.constant 0 : index
    %c0_13 = arith.constant 0 : index
    %13 = vector.load %arg5[%c0_12, %c0_13] : memref<1x32xf32, #tpu.memory_space<vmem>>, vector<1x32xf32>
    %14 = vector.broadcast %13 : vector<1x32xf32> to vector<2x32xf32>
    %15 = arith.addf %12, %14 : vector<2x32xf32>
    %16 = arith.negf %15 : vector<2x32xf32>
    %17 = math.exp %16 : vector<2x32xf32>
    %cst_14 = arith.constant 1.000000e+00 : f32
    %18 = vector.broadcast %cst_14 : f32 to vector<2x32xf32>
    %19 = arith.addf %18, %17 : vector<2x32xf32>
    %20 = arith.divf %18, %19 : vector<2x32xf32>
    %21 = vector.shape_cast %20 : vector<2x32xf32> to vector<2x32x1xf32>
    %22 = vector.broadcast %21 : vector<2x32x1xf32> to vector<2x32x256xf32>
    %23 = arith.mulf %0, %22 : vector<2x32x256xf32>
    %c0_15 = arith.constant 0 : index
    %c0_16 = arith.constant 0 : index
    %c0_17 = arith.constant 0 : index
    %24 = vector.load %arg6[%c0_15, %c0_16, %c0_17] : memref<2x32x256xf32, #tpu.memory_space<vmem>>, vector<2x32x256xf32>
    tpu.vector_store %arg6[%c0_15, %c0_16, %c0_17], %23 {strides = array<i32>} : memref<2x32x256xf32, #tpu.memory_space<vmem>>, vector<2x32x256xf32>,
    return
  }
  func.func @transform_0(%arg0: i32) -> (i32, i32, i32) {
    %c0_i32 = arith.constant 0 : i32
    %c0_i32_0 = arith.constant 0 : i32
    %c0_i32_1 = arith.constant 0 : i32
    return %arg0, %c0_i32, %c0_i32_0 : i32, i32, i32
  }
  func.func @transform_1(%arg0: i32) -> (i32, i32) {
    %c0_i32 = arith.constant 0 : i32
    %c0_i32_0 = arith.constant 0 : i32
    %c0_i32_1 = arith.constant 0 : i32
    return %c0_i32, %c0_i32_0 : i32, i32
  }
  func.func @transform_2(%arg0: i32) -> (i32, i32) {
    %c0_i32 = arith.constant 0 : i32
    %c0_i32_0 = arith.constant 0 : i32
    %c0_i32_1 = arith.constant 0 : i32
    return %c0_i32, %c0_i32_0 : i32, i32
  }
  func.func @transform_3(%arg0: i32) -> (i32, i32) {
    %c0_i32 = arith.constant 0 : i32
    %c0_i32_0 = arith.constant 0 : i32
    %c0_i32_1 = arith.constant 0 : i32
    return %c0_i32, %c0_i32_0 : i32, i32
  }
  func.func @transform_4(%arg0: i32) -> (i32, i32) {
    %c0_i32 = arith.constant 0 : i32
    %c0_i32_0 = arith.constant 0 : i32
    %c0_i32_1 = arith.constant 0 : i32
    return %c0_i32, %c0_i32_0 : i32, i32
  }
  func.func @transform_5(%arg0: i32) -> (i32, i32, i32) {
    %c0_i32 = arith.constant 0 : i32
    %c0_i32_0 = arith.constant 0 : i32
    %c0_i32_1 = arith.constant 0 : i32
    return %arg0, %c0_i32, %c0_i32_0 : i32, i32, i32
  }
}

</mosaic_0001>

<bundles_post_ra>
// kernel: tpu_custom_call.1
= control target key start
LH: loop header
LB: loop body
LE: loop exit
PB: predicated region body
PF: predicated region fallthrough
CT: control target
= control target key end

     0   :  { %10 = vsyncpa [#allocation3], 0  ;;  %s508_s0 = inlined_call_operand.hbm [shape: f32[2,32,256], index: 0, kind: input, shape index: {}]   ;;  %s509_s1 = inlined_call_operand.vmem [shape: f32[32,4], index: 1, kind: input, shape index: {}]   ;;  %s510_s2 = inlined_call_operand.vmem [shape: f32[1,4], index: 2, kind: input, shape index: {}]   ;;  %s511_s3 = inlined_call_operand.vmem [shape: f32[4,32], index: 3, kind: input, shape index: {}]   ;;  %s512_s4 = inlined_call_operand.vmem [shape: f32[1,32], index: 4, kind: input, shape index: {}]   ;;  %s513_s5 = inlined_call_operand.hbm [shape: f32[2,32,256], index: 5, kind: output, shape index: {}]  }
   0x1   :  { %11 = vsyncpa [#allocation4], 0  ;;  %s16_s20 = sshll.u32 %s508_s0, 4  ;;  %s377_s21 = smov [#allocation2]   ;;  %s17_s20 = int_to_ptr.hbm [resolvable:$true] %s16_s20 }
   0x2   :  { %s18_s22 = sshll.u32 %s377_s21, 4  ;;  %s378_s23 = smov 256   ;;  %s19_s22 = int_to_ptr.vmem [resolvable:$true] %s18_s22 }
   0x3   :  { %s379_s24 = smov 16  }
   0x4   :  { %24 = dma.hbm_to_vmem [thread:$0]  %s17_s20, 2048, %s19_s22, [#allocation3], %s378_s23, %s378_s23, %s379_s24  }
   0x5   :  { %373 = dma.done.wait [#allocation3], 2048  }
   0x6   :  { %374 = vsyncadd [#allocation3], 4294965248  ;;  %v417_v0 = vld [vmem:[#allocation2 + $0x40] sm:$0xff]  ;;  %v419_v1 = vld [vmem:[#allocation2 + $0x48] sm:$0xff]  ;;  %v101_v31 = vlaneseq  ;;  %vm106_vm0 = vcmask 130112   ;;  %vm110_vm1 = vcmask 195712  }
   0x7   :  { %v421_v2 = vld [vmem:[#allocation2] sm:$0xff]  ;;  %v65_v3 = vadd.f32 %v419_v1, %v417_v0  ;;  %v425_v4 = vld [vmem:[#allocation2 + $0x8] sm:$0xff]  ;;  %v435_v9 = vld [vmem:[#allocation2 + $0x50] sm:$0xff]  ;;  %vm114_vm2 = vcmask 261312   ;;  %vm123_vm3 = vcmask 1041409   ;;  %vm125_vm4 = vcmask 261120  }
   0x8   :  { %v427_v5 = vld [vmem:[#allocation2 + $0x20] sm:$0xff]  ;;  %v429_v6 = vld [vmem:[#allocation2 + $0x28] sm:$0xff]  ;;  %v53_v7 = vadd.f32 %v425_v4, %v421_v2  ;;  %v437_v10 = vld [vmem:[#allocation2 + $0x58] sm:$0xff]  ;;  %v102_v32 = vand.u32 127, %v101_v31  ;;  %vm158_vm5 = vcmask 1043456   ;;  %vm154_vm6 = vcmask 31744  }
   0x9   :  { %v59_v8 = vadd.f32 %v429_v6, %v427_v5  ;;  %66 = vadd.xlane.f32.xlu1 %v65_v3  ;;  %v439_v11 = vld [vmem:[#allocation2 + $0x10] sm:$0xff]  ;;  %v441_v12 = vld [vmem:[#allocation2 + $0x18] sm:$0xff]  ;;  %v443_v13 = vld [vmem:[#allocation2 + $0x60] sm:$0xff]  ;;  %v68_v15 = vadd.f32 %v437_v10, %v435_v9  ;;  %s289_s13 = sshll.u32 %s513_s5, 4  ;;  %s290_s13 = int_to_ptr.hbm [resolvable:$true] %s289_s13 }
   0xa   :  { %54 = vadd.xlane.f32.xlu0 %v53_v7  ;;  %v445_v14 = vld [vmem:[#allocation2 + $0x68] sm:$0xff]  ;;  %v56_v16 = vadd.f32 %v441_v12, %v439_v11  ;;  %v453_v18 = vld [vmem:[#allocation2 + $0x70] sm:$0xff]  ;;  %v455_v19 = vld [vmem:[#allocation2 + $0x78] sm:$0xff]  ;;  %v104_v34 = vadd.s32 4294967288, %v102_v32  ;;  %v108_v43 = vadd.s32 4294967280, %v102_v32  ;;  %v112_v47 = vadd.s32 4294967272, %v102_v32 }
   0xb   :  { %60 = vadd.xlane.f32.xlu2 %v59_v8  ;;  %v71_v17 = vadd.f32 %v445_v14, %v443_v13  ;;  %v457_v20 = vld [vmem:[#allocation2 + $0x30] sm:$0xff]  ;;  %v459_v21 = vld [vmem:[#allocation2 + $0x38] sm:$0xff]  ;;  %v74_v22 = vadd.f32 %v455_v19, %v453_v18  ;;  %v86_v26 = vld [vmem:[%s509_s1 + $0x8] sm:$0xff] }
   0xc   :  { %v62_v23 = vadd.f32 %v459_v21, %v457_v20  ;;  %v88_v24 = vld [vmem:[%s509_s1 + $0x18] sm:$0xff]  ;;  %v87_v25 = vld [vmem:[%s509_s1 + $0x10] sm:$0xff]  ;;  %v85_v27 = vld [vmem:[%s509_s1] sm:$0xff] }
   0xd   :  { %140 = vmatpush.msra.mxu0 %v88_v24  ;;  %v149_v3 = vld [vmem:[%s511_s3] sm:$0xf] }
   0xe   :  { %303 = vmatpush.msk.msra.mxu1 %vm158_vm5, %v149_v3  ;;  %v319_v7 = vld [vmem:[%s510_s2] ss:$0 sm:$0xff]  ;;  %s380_s2 = smov [#allocation5]  }
   0xf   :  { %141 = vmatpush.msra.mxu0 %v87_v25  ;;  %v320_v24 = vld [vmem:[%s512_s4] ss:$0 sm:$0xff]  ;;  %s287_s3 = sshll.u32 %s380_s2, 4  ;;  %s288_s3 = int_to_ptr.vmem [resolvable:$true] %s287_s3 }
  0x11   :  { %69 = vadd.xlane.f32.xlu1 %v68_v15  ;;  %142 = vmatpush.msra.mxu0 %v86_v26 }
  0x12   :  { %57 = vadd.xlane.f32.xlu0 %v56_v16 }
  0x13   :  { %72 = vadd.xlane.f32.xlu2 %v71_v17  ;;  %143 = vmatpush.msra.mxu0 %v85_v27  ;;  %v203_v17 = vshrl.u32 %v101_v31, 7 }
  0x15   :  { %310 = vset.pattern.permute.xlu2 %v203_v17 }
  0x19   :  { %75 = vadd.xlane.f32.xlu1 %v74_v22  ;;  %v216_v22 = vadd.s32 16, %v203_v17 }
  0x1a   :  { %63 = vadd.xlane.f32.xlu0 %v62_v23  ;;  %v210_v23 = vadd.s32 8, %v203_v17 }
  0x1b   :  { %312 = vset.pattern.permute.xlu1 %v216_v22 }
  0x1c   :  { %311 = vset.pattern.permute.xlu0 %v210_v23 }
  0x7c   :  { %v67_v28 = vpop.xlane.xlu1 %66 }
  0x7d   :  { %v55_v29 = vpop.xlane.xlu0 %54  ;;  %v81_v39 = vmul.f32 0.00390625, %v67_v28 }
  0x7e   :  { %v61_v30 = vpop.xlane.xlu2 %60  ;;  %v77_v40 = vmul.f32 0.00390625, %v55_v29 }
  0x7f   :  { %v116_v45 = vperm.slane %v81_v39, %v102_v32  ;;  %v79_v46 = vmul.f32 0.00390625, %v61_v30 }
  0x80   :  { %v103_v48 = vperm.slane %v77_v40, %v102_v32 }
  0x81   :  { %v109_v56 = vperm.slane %v79_v46, %v108_v43 }
  0x84   :  { %v70_v33 = vpop.xlane.xlu1 %69 }
  0x85   :  { %v82_v35 = vmul.f32 0.00390625, %v70_v33  ;;  %v58_v36 = vpop.xlane.xlu0 %57 }
  0x86   :  { %v73_v37 = vpop.xlane.xlu2 %72  ;;  %v78_v38 = vmul.f32 0.00390625, %v58_v36 }
  0x87   :  { %v83_v41 = vmul.f32 0.00390625, %v73_v37  ;;  %v117_v42 = vperm.slane %v82_v35, %v104_v34 }
  0x88   :  { %v105_v44 = vperm.slane %v78_v38, %v104_v34 }
  0x89   :  { %v119_v49 = vperm.slane %v83_v41, %v108_v43  ;;  %v118_v51 = vsel %vm106_vm0, %v117_v42, %v116_v45  ;;  %v222_v41 = vadd.s32 24, %v203_v17 }
  0x8a   :  { %v107_v54 = vsel %vm106_vm0, %v105_v44, %v103_v48 }
  0x8b   :  { %v120_v59 = vsel %vm110_vm1, %v119_v49, %v118_v51  ;;  %v111_v60 = vsel %vm110_vm1, %v109_v56, %v107_v54 }
  0x8c   :  { %v76_v50 = vpop.xlane.xlu1 %75 }
  0x8d   :  { %v84_v52 = vmul.f32 0.00390625, %v76_v50  ;;  %v64_v53 = vpop.xlane.xlu0 %63 }
  0x8e   :  { %v80_v55 = vmul.f32 0.00390625, %v64_v53 }
  0x8f   :  { %v121_v57 = vperm.slane %v84_v52, %v112_v47 }
  0x90   :  { %v113_v58 = vperm.slane %v80_v55, %v112_v47 }
  0x91   :  { %v122_v61 = vsel %vm114_vm2, %v121_v57, %v120_v59 }
  0x92   :  { %v115_v62 = vsel %vm114_vm2, %v113_v58, %v111_v60 }
  0x93   :  { %v124_v63 = vsel %vm123_vm3, %v122_v61, %v115_v62 }
  0x94   :  { %302 = vmatmul.msk.f32.vlgmr.msra.gmra.mxu0 %vm125_vm4, %v124_v63 }
 0x111   :  { %v145_v8 = vpop.f32.mrf.mxu0 }
 0x112   :  { %v146_v15 = vadd.f32 %v319_v7, %v145_v8 }
 0x114   :  { %v148_v16 = vmax.f32 %v146_v15, 0.0 }
 0x116   :  { %304 = vmatmul.msk.f32.vlgmr.msra.gmra.mxu1 %vm154_vm6, %v148_v16 }
 0x193   :  { %v179_v25 = vpop.f32.mrf.mxu1 }
 0x194   :  { %v180_v26 = vadd.f32 %v320_v24, %v179_v25 }
 0x196   :  { %v305_v27 = vmul.f32 -1.442695, %v180_v26 }
 0x198   :  { %321 = vpow2.f32 %v305_v27 }
 0x19e   :  { %v322_v28 = vpop.eup %321 }
 0x19f   :  { %v185_v29 = vadd.f32 1.0, %v322_v28 }
 0x1a1   :  { %323 = vrcp.f32 %v185_v29  ;;  %v197_v31 = vand.u32 2147483648, %v185_v29  ;;  %v195_v35 = vand.u32 2147483647, %v185_v29  ;;  %vm191_vm8 = vweird.f32 %v185_v29 }
 0x1a3   :  { %v198_v37 = vor.u32 1.1754944e-38, %v197_v31  ;;  %vm196_vm10 = vcmp.eq.f32.partialorder %v195_v35, 8.507059e+37 }
 0x1a7   :  { %v324_v30 = vpop.eup %323 }
 0x1a8   :  { %v187_v32 = vmul.f32 %v324_v30, %v185_v29  ;;  %vm192_vm7 = vweird.f32 %v324_v30 }
 0x1a9   :  { %vm193_vm9 = vmor %vm191_vm8, %vm192_vm7 }
 0x1aa   :  { %v188_v33 = vsub.f32 1.0, %v187_v32 }
 0x1ac   :  { %v189_v34 = vmul.f32 %v324_v30, %v188_v33 }
 0x1ae   :  { %v190_v36 = vadd.f32 %v324_v30, %v189_v34 }
 0x1b0   :  { %v194_v38 = vsel %vm193_vm9, %v324_v30, %v190_v36 }
 0x1b1   :  { %v199_v39 = vsel %vm196_vm10, %v198_v37, %v194_v38 }
 0x1b2   :  { %v201_v40 = vperm.slane %v199_v39, 0  ;;  %v226_v42 = vperm.slane %v199_v39, 1 }
 0x1b4   :  { %218 = vperm.xlu1 %312, %v201_v40   ;;  %212 = vperm.xlu0 %311, %v201_v40  }
 0x1b5   :  { %206 = vperm.xlu2 %310, %v201_v40  }
 0x1bc   :  { %315 = vset.pattern.permute.xlu1 %v210_v23  ;;  %318 = vset.pattern.permute.xlu0 %v222_v41 }
 0x1bd   :  { %313 = vset.pattern.permute.xlu2 %v222_v41 }
 0x1c4   :  { %237 = vperm.xlu1 %315, %v226_v42  }
 0x1c5   :  { %224 = vperm.xlu2 %313, %v201_v40  }
 0x1cc   :  { %317 = vset.pattern.permute.xlu1 %v222_v41 }
 0x1cd   :  { %314 = vset.pattern.permute.xlu2 %v203_v17 }
 0x1d4   :  { %249 = vperm.xlu1 %317, %v226_v42  }
 0x1d5   :  { %231 = vperm.xlu2 %314, %v226_v42  }
 0x1dd   :  { %316 = vset.pattern.permute.xlu2 %v216_v22 }
 0x1e5   :  { %243 = vperm.xlu2 %316, %v226_v42  }
 0x20f   :  { %v207_v43 = vpop.permute.xlu2 %206 }
 0x210   :  { %v251_v44 = vmul.f32 %v207_v43, %v421_v2  ;;  %v252_v45 = vmul.f32 %v207_v43, %v425_v4 }
 0x212   :  { %267 = vst [vmem:[#allocation5] sm:$0xff] %v251_v44 }
 0x213   :  { %268 = vst [vmem:[#allocation5 + $0x8] sm:$0xff] %v252_v45 }
 0x21f   :  { %v225_v46 = vpop.permute.xlu2 %224 }
 0x220   :  { %v257_v47 = vmul.f32 %v225_v46, %v457_v20  ;;  %v258_v48 = vmul.f32 %v225_v46, %v459_v21 }
 0x222   :  { %273 = vst [vmem:[#allocation5 + $0x30] sm:$0xff] %v257_v47 }
 0x223   :  { %274 = vst [vmem:[#allocation5 + $0x38] sm:$0xff] %v258_v48 }
 0x226   :  { %v219_v49 = vpop.permute.xlu1 %218  ;;  %v213_v50 = vpop.permute.xlu0 %212 }
 0x227   :  { %v255_v51 = vmul.f32 %v219_v49, %v427_v5  ;;  %v256_v52 = vmul.f32 %v219_v49, %v429_v6  ;;  %v253_v53 = vmul.f32 %v213_v50, %v439_v11  ;;  %v254_v2 = vmul.f32 %v213_v50, %v441_v12 }
 0x229   :  { %271 = vst [vmem:[#allocation5 + $0x20] sm:$0xff] %v255_v51 }
 0x22a   :  { %272 = vst [vmem:[#allocation5 + $0x28] sm:$0xff] %v256_v52 }
 0x22b   :  { %269 = vst [vmem:[#allocation5 + $0x10] sm:$0xff] %v253_v53 }
 0x22c   :  { %270 = vst [vmem:[#allocation5 + $0x18] sm:$0xff] %v254_v2 }
 0x22f   :  { %v232_v4 = vpop.permute.xlu2 %231 }
 0x230   :  { %v259_v20 = vmul.f32 %v232_v4, %v417_v0  ;;  %v260_v21 = vmul.f32 %v232_v4, %v419_v1 }
 0x232   :  { %275 = vst [vmem:[#allocation5 + $0x40] sm:$0xff] %v259_v20 }
 0x233   :  { %276 = vst [vmem:[#allocation5 + $0x48] sm:$0xff] %v260_v21 }
 0x236   :  { %v238_v54 = vpop.permute.xlu1 %237 }
 0x237   :  { %v261_v5 = vmul.f32 %v238_v54, %v435_v9  ;;  %v262_v6 = vmul.f32 %v238_v54, %v437_v10 }
 0x239   :  { %277 = vst [vmem:[#allocation5 + $0x50] sm:$0xff] %v261_v5 }
 0x23a   :  { %278 = vst [vmem:[#allocation5 + $0x58] sm:$0xff] %v262_v6 }
 0x23f   :  { %v244_v11 = vpop.permute.xlu2 %243 }
 0x240   :  { %v263_v12 = vmul.f32 %v244_v11, %v443_v13  ;;  %v264_v55 = vmul.f32 %v244_v11, %v445_v14 }
 0x242   :  { %279 = vst [vmem:[#allocation5 + $0x60] sm:$0xff] %v263_v12 }
 0x243   :  { %280 = vst [vmem:[#allocation5 + $0x68] sm:$0xff] %v264_v55 }
 0x246   :  { %v250_v0 = vpop.permute.xlu1 %249 }
 0x247   :  { %v265_v1 = vmul.f32 %v250_v0, %v453_v18  ;;  %v266_v9 = vmul.f32 %v250_v0, %v455_v19 }
 0x249   :  { %281 = vst [vmem:[#allocation5 + $0x70] sm:$0xff] %v265_v1 }
 0x24a   :  { %282 = vst [vmem:[#allocation5 + $0x78] sm:$0xff] %v266_v9 }
 0x24b   :  { %295 = dma.vmem_to_hbm [thread:$0]  %s288_s3, 2048, %s290_s13, [#allocation4], %s378_s23, %s378_s23, %s379_s24  }
 0x24c   :  { %375 = dma.done.wait [#allocation4], 2048  }
 0x24d   :  { %376 = vsyncadd [#allocation4], 4294965248 }
 0x24e   :  { %300 = vsyncpa [#allocation3], 1 }
 0x24f   :  { %301 = vsyncpa [#allocation4], 1 }

</bundles_post_ra>
